<compile_context>
chip_gen: v7x
topology: tpu7x:2x2x1
jax: 0.10.0
libtpu: 0.0.40
codegen_flags: <defaults>
</compile_context>

<pallas_src>
import functools

import jax
import jax.numpy as jnp
from jax.experimental import pallas as pl
from jax.experimental.pallas import tpu as pltpu

LANES = 128
SUBLANES = 8


def _sublane_multiple(dtype) -> int:
    """Row-tile multiple keeping sub-32-bit dtypes packed-register aligned."""
    itemsize = jnp.dtype(dtype).itemsize
    return SUBLANES * max(1, 4 // itemsize)   # f32 -> 8, bf16 -> 16, int8/bool -> 32


def _focal_loss_kernel(x_ref, t_ref, out_ref, *, gamma, alpha, n_valid, needs_mask):
    """One (tr, 128) tile -> one (8, 128) partial-sum output block."""
    i = pl.program_id(0)
    tr = x_ref.shape[0]

    x = x_ref[...].astype(jnp.float32)
    t = t_ref[...].astype(jnp.float32)

    # Shared transcendental: e = exp(-|x|) feeds both the numerically-stable
    # BCE-with-logits term and the sigmoid.
    e = jnp.exp(-jnp.abs(x))
    bce = jnp.maximum(x, 0.0) - x * t + jnp.log1p(e)

    # sigmoid(x) = 1/(1+e) for x >= 0, e/(1+e) for x < 0.  Approximate
    # reciprocal on the EUP + Newton refinement on the VPU (cheap slots).
    d = 1.0 + e
    r = pl.reciprocal(d, approx=True)
    r = r * (2.0 - d * r)
    r = r * (2.0 - d * r)
    p = jnp.where(x >= 0.0, r, e * r)

    p_t = jnp.where(t >= 0.5, p, 1.0 - p)
    one_m_pt = 1.0 - p_t

    # (1 - p_t) ** gamma: integer gamma lowers to plain multiplies instead of
    # exp(gamma * log(.)).
    if float(gamma).is_integer() and 0 <= int(gamma) <= 8:
        ig = int(gamma)
        if ig == 0:
            mod = jnp.ones_like(one_m_pt)
        else:
            mod = one_m_pt
            for _ in range(ig - 1):
                mod = mod * one_m_pt
    else:
        mod = one_m_pt ** jnp.float32(gamma)

    alpha_t = alpha * t + (1.0 - alpha) * (1.0 - t)
    focal = alpha_t * mod * bce

    if needs_mask:
        # Zero out lane-pad / ragged-last-block elements.  Validity is derived
        # from the global element index -- no third HBM input stream needed.
        row_ids = jax.lax.broadcasted_iota(jnp.int32, (tr, LANES), 0)
        col_ids = jax.lax.broadcasted_iota(jnp.int32, (tr, LANES), 1)
        idx = (i * tr + row_ids) * LANES + col_ids
        focal = jnp.where(idx < n_valid, focal, 0.0)

    # Reduce (tr, 128) -> (8, 128) with pure vreg-wise adds (VPU only); every
    # grid step is independent, so the grid axis can be "parallel".
    out_ref[0, :, :] = jnp.sum(
        focal.reshape(tr // SUBLANES, SUBLANES, LANES), axis=0)


def focal_loss(logits, targets, gamma=2.0, alpha=0.5, size_average="mean",
               block_rows=2048):
    """Pallas TPU focal loss matching the PyTorch FocalLoss forward.

    Returns a float32 scalar ('mean' or 'sum').  Inputs may be any float /
    integer dtype; they are upcast to f32 inside the kernel (feed bf16 to halve
    HBM traffic).
    """
    assert logits.shape == targets.shape
    n_elems = int(logits.size)
    # TODO(synk): int32 in-kernel index math limits masked inputs to < 2**31 elements.

    x = logits.reshape(-1)
    t = targets.reshape(-1)

    # Pad only up to the next lane multiple (< 128 extra elements).  For the
    # common case (total size already a multiple of 128) this is a free reshape
    # with no extra HBM copy; ragged row counts are handled by in-kernel
    # masking rather than by padding whole (8*128) tiles.
    lane_pad = (-n_elems) % LANES
    if lane_pad:
        x = jnp.pad(x, (0, lane_pad))
        t = jnp.pad(t, (0, lane_pad))
    rows = (n_elems + lane_pad) // LANES
    x2 = x.reshape(rows, LANES)
    t2 = t.reshape(rows, LANES)

    # Row tile: as large as requested, multiple of the packing-aware sublane
    # multiple, never (much) larger than the array itself.  grid = cdiv -- the
    # ragged last block is masked in-kernel, never shrunk.
    sub = max(_sublane_multiple(x2.dtype), _sublane_multiple(t2.dtype))
    tr = min(int(block_rows), pl.cdiv(rows, sub) * sub)
    tr = max(sub, (tr // sub) * sub)
    num_blocks = pl.cdiv(rows, tr)
    needs_mask = (num_blocks * tr * LANES) != n_elems

    kernel = functools.partial(
        _focal_loss_kernel, gamma=float(gamma), alpha=float(alpha),
        n_valid=n_elems, needs_mask=needs_mask)

    partials = pl.pallas_call(
        kernel,
        out_shape=jax.ShapeDtypeStruct((num_blocks, SUBLANES, LANES),
                                       jnp.float32),
        grid_spec=pltpu.PrefetchScalarGridSpec(
            num_scalar_prefetch=0,
            grid=(num_blocks,),
            in_specs=[
                pl.BlockSpec((tr, LANES), lambda i: (i, 0)),
                pl.BlockSpec((tr, LANES), lambda i: (i, 0)),
            ],
            out_specs=pl.BlockSpec((1, SUBLANES, LANES), lambda i: (i, 0, 0)),
        ),
        compiler_params=pltpu.CompilerParams(
            dimension_semantics=("parallel",)),
    )(x2, t2)

    total = jnp.sum(partials, dtype=jnp.float32)
    if size_average == "mean":
        return total / jnp.float32(n_elems)
    return total


def _reference_focal_loss(x, t, gamma=2.0, alpha=0.5, size_average="mean"):
    x = x.astype(jnp.float32)
    t = t.astype(jnp.float32)
    bce = jnp.maximum(x, 0.0) - x * t + jnp.log1p(jnp.exp(-jnp.abs(x)))
    p = jax.nn.sigmoid(x)
    p_t = jnp.where(t >= 0.5, p, 1.0 - p)
    fl = (alpha * t + (1.0 - alpha) * (1.0 - t)) * (1.0 - p_t) ** gamma * bce
    return fl.mean() if size_average == "mean" else fl.sum()


if __name__ == "__main__":
    key = jax.random.PRNGKey(0)
    k1, k2 = jax.random.split(key)

    # NCHW, small shapes: batch=2, channels=4, spatial=16x16.
    logits = jax.random.normal(k1, (2, 4, 16, 16), dtype=jnp.float32)
    targets = (jax.random.uniform(k2, (2, 4, 16, 16)) > 0.5).astype(jnp.float32)

    out = focal_loss(logits, targets, gamma=2.0, alpha=0.5, size_average="mean")
    out = jax.block_until_ready(out)
    ref = _reference_focal_loss(logits, targets)
    assert jnp.allclose(out, ref, rtol=1e-5, atol=1e-6), (out, ref)

    # 'sum' reduction.
    out_s = jax.block_until_ready(focal_loss(logits, targets, size_average="sum"))
    ref_s = _reference_focal_loss(logits, targets, size_average="sum")
    assert jnp.allclose(out_s, ref_s, rtol=1e-5, atol=1e-5), (out_s, ref_s)

    # Ragged size (1155 elements) exercising the in-kernel masking path.
    x3 = jax.random.normal(k1, (3, 5, 7, 11), dtype=jnp.float32)
    t3 = (jax.random.uniform(k2, (3, 5, 7, 11)) > 0.5).astype(jnp.float32)
    out3 = jax.block_until_ready(focal_loss(x3, t3))
    ref3 = _reference_focal_loss(x3, t3)
    assert jnp.allclose(out3, ref3, rtol=1e-5, atol=1e-6), (out3, ref3)

    print("KERNEL_OK")
</pallas_src>

<mosaic_0001>
module attributes {stable_mosaic.version = 11 : i64} {
  func.func @_focal_loss_kernel(%arg0: i32, %arg1: memref<16x128xf32, #tpu.memory_space<vmem>>, %arg2: memref<16x128xf32, #tpu.memory_space<vmem>>, %arg3: memref<1x8x128xf32, #tpu.memory_space<vmem>>) attributes {dimension_semantics = [#tpu.dimension_semantics<parallel>], iteration_bounds = array<i64: 1>, scalar_prefetch = 0 : i64, scratch_operands = 0 : i64, tpu.core_type = #tpu.core_type<tc>, window_params = [{transform_indices = @transform_0, window_bounds = array<i64: 16, 128>}, {transform_indices = @transform_1, window_bounds = array<i64: 16, 128>}, {transform_indices = @transform_2, window_bounds = array<i64: 1, 8, 128>}]} {
    %c0 = arith.constant 0 : index
    %c0_0 = arith.constant 0 : index
    %0 = vector.load %arg1[%c0, %c0_0] : memref<16x128xf32, #tpu.memory_space<vmem>>, vector<16x128xf32>
    %c0_1 = arith.constant 0 : index
    %c0_2 = arith.constant 0 : index
    %1 = vector.load %arg2[%c0_1, %c0_2] : memref<16x128xf32, #tpu.memory_space<vmem>>, vector<16x128xf32>
    %2 = math.absf %0 : vector<16x128xf32>
    %cst = arith.constant 0.000000e+00 : f32
    %3 = vector.broadcast %cst : f32 to vector<16x128xf32>
    %4 = arith.subf %3, %2 : vector<16x128xf32>
    %5 = math.exp %4 : vector<16x128xf32>
    %cst_3 = arith.constant 0.000000e+00 : f32
    %6 = vector.broadcast %cst_3 : f32 to vector<16x128xf32>
    %7 = arith.maximumf %0, %6 : vector<16x128xf32>
    %8 = arith.mulf %0, %1 : vector<16x128xf32>
    %9 = arith.subf %7, %8 : vector<16x128xf32>
    %10 = math.log1p %5 : vector<16x128xf32>
    %11 = arith.addf %9, %10 : vector<16x128xf32>
    %cst_4 = arith.constant 1.000000e+00 : f32
    %12 = vector.broadcast %cst_4 : f32 to vector<16x128xf32>
    %13 = arith.addf %12, %5 : vector<16x128xf32>
    %14 = tpu.reciprocal %13 {approx = true} : vector<16x128xf32> -> vector<16x128xf32>
    %15 = arith.mulf %13, %14 : vector<16x128xf32>
    %cst_5 = arith.constant 2.000000e+00 : f32
    %16 = vector.broadcast %cst_5 : f32 to vector<16x128xf32>
    %17 = arith.subf %16, %15 : vector<16x128xf32>
    %18 = arith.mulf %14, %17 : vector<16x128xf32>
    %19 = arith.mulf %13, %18 : vector<16x128xf32>
    %cst_6 = arith.constant 2.000000e+00 : f32
    %20 = vector.broadcast %cst_6 : f32 to vector<16x128xf32>
    %21 = arith.subf %20, %19 : vector<16x128xf32>
    %22 = arith.mulf %18, %21 : vector<16x128xf32>
    %cst_7 = arith.constant 0.000000e+00 : f32
    %23 = vector.broadcast %cst_7 : f32 to vector<16x128xf32>
    %24 = arith.cmpf oge, %0, %23 : vector<16x128xf32>
    %25 = arith.mulf %5, %22 : vector<16x128xf32>
    %26 = arith.select %24, %22, %25 : vector<16x128xi1>, vector<16x128xf32>
    %cst_8 = arith.constant 5.000000e-01 : f32
    %27 = vector.broadcast %cst_8 : f32 to vector<16x128xf32>
    %28 = arith.cmpf oge, %1, %27 : vector<16x128xf32>
    %cst_9 = arith.constant 1.000000e+00 : f32
    %29 = vector.broadcast %cst_9 : f32 to vector<16x128xf32>
    %30 = arith.subf %29, %26 : vector<16x128xf32>
    %31 = arith.select %28, %26, %30 : vector<16x128xi1>, vector<16x128xf32>
    %cst_10 = arith.constant 1.000000e+00 : f32
    %32 = vector.broadcast %cst_10 : f32 to vector<16x128xf32>
    %33 = arith.subf %32, %31 : vector<16x128xf32>
    %34 = arith.mulf %33, %33 : vector<16x128xf32>
    %cst_11 = arith.constant 5.000000e-01 : f32
    %35 = vector.broadcast %cst_11 : f32 to vector<16x128xf32>
    %36 = arith.mulf %35, %1 : vector<16x128xf32>
    %cst_12 = arith.constant 1.000000e+00 : f32
    %37 = vector.broadcast %cst_12 : f32 to vector<16x128xf32>
    %38 = arith.subf %37, %1 : vector<16x128xf32>
    %cst_13 = arith.constant 5.000000e-01 : f32
    %39 = vector.broadcast %cst_13 : f32 to vector<16x128xf32>
    %40 = arith.mulf %39, %38 : vector<16x128xf32>
    %41 = arith.addf %36, %40 : vector<16x128xf32>
    %42 = arith.mulf %41, %34 : vector<16x128xf32>
    %43 = arith.mulf %42, %11 : vector<16x128xf32>
    %44 = vector.shape_cast %43 : vector<16x128xf32> to vector<2x8x128xf32>
    %cst_14 = arith.constant dense<0.000000e+00> : vector<8x128xf32>
    %45 = vector.multi_reduction <add>, %44, %cst_14 [0] : vector<2x8x128xf32> to vector<8x128xf32>
    %c0_15 = arith.constant 0 : index
    %c0_16 = arith.constant 0 : index
    %c0_17 = arith.constant 0 : index
    %46 = vector.load %arg3[%c0_15, %c0_16, %c0_17] : memref<1x8x128xf32, #tpu.memory_space<vmem>>, vector<1x8x128xf32>
    %47 = vector.shape_cast %46 : vector<1x8x128xf32> to vector<8x128xf32>
    %48 = vector.shape_cast %45 : vector<8x128xf32> to vector<1x8x128xf32>
    tpu.vector_store %arg3[%c0_15, %c0_16, %c0_17], %48 {strides = array<i32>} : memref<1x8x128xf32, #tpu.memory_space<vmem>>, vector<1x8x128xf32>,
    return
  }
  func.func @transform_0(%arg0: i32) -> (i32, i32) {
    %c0_i32 = arith.constant 0 : i32
    %c0_i32_0 = arith.constant 0 : i32
    return %arg0, %c0_i32 : i32, i32
  }
  func.func @transform_1(%arg0: i32) -> (i32, i32) {
    %c0_i32 = arith.constant 0 : i32
    %c0_i32_0 = arith.constant 0 : i32
    return %arg0, %c0_i32 : i32, i32
  }
  func.func @transform_2(%arg0: i32) -> (i32, i32, i32) {
    %c0_i32 = arith.constant 0 : i32
    %c0_i32_0 = arith.constant 0 : i32
    %c0_i32_1 = arith.constant 0 : i32
    return %arg0, %c0_i32, %c0_i32_0 : i32, i32, i32
  }
}

</mosaic_0001>

<bundles_post_ra>
// kernel: tpu_custom_call.1
= control target key start
LH: loop header
LB: loop body
LE: loop exit
PB: predicated region body
PF: predicated region fallthrough
CT: control target
= control target key end

     0   :  { %7 = vsyncpa [#allocation3], 0  ;;  %s315_s0 = inlined_call_operand.hbm [shape: f32[16,128], index: 0, kind: input, shape index: {}]   ;;  %s316_s1 = inlined_call_operand.hbm [shape: f32[16,128], index: 1, kind: input, shape index: {}]   ;;  %s317_s2 = inlined_call_operand.hbm [shape: f32[1,8,128], index: 2, kind: output, shape index: {}]  }
   0x1   :  { %8 = vsyncpa [#allocation6], 0 }
   0x2   :  { %9 = vsyncpa [#allocation4], 0  ;;  %s229_s9 = smov [#allocation2]   ;;  %s157_s13 = scalar_lea.hbm %s315_s0, 256 }
   0x3   :  { %s15_s10 = sshll.u32 %s229_s9, 4  ;;  %p158_p0 = scmp.ne.s32.totalorder %s315_s0, %s157_s13  ;;  %s16_s10 = int_to_ptr.vmem [resolvable:$true] %s15_s10 }
   0x4   :  { %p161_p1 = scmp.lt.u32.totalorder %s157_s13, %s315_s0 }
   0x6   :  { %p163_p2 = pnand %p161_p1, %p158_p0 }
   0x8   :  { %166 = shalt.err (!%p163_p2)
}
   0x9   :  { %s167_s18 = scalar_lea.vmem %s16_s10, 256  ;;  %p172_p4 = scmp.lt.s32.totalorder %s16_s10, %s16_s10 }
   0xa   :  { %p168_p3 = scmp.ne.s32.totalorder %s16_s10, %s167_s18  ;;  %p173_p5 = scmp.lt.s32.totalorder %s167_s18, %s167_s18 }
   0xc   :  { %p174_p6 = por %p173_p5, %p172_p4 }
   0xe   :  { %p175_p7 = pnand %p174_p6, %p168_p3 }
  0x10   :  { %178 = shalt.err (!%p175_p7)
}
  0x11   :  { %s230_s19 = smov 128   ;;  %s231_s20 = smov 8  }
  0x12   :  { %21 = dma.hbm_to_vmem [thread:$0]  %s315_s0, 256, %s16_s10, [#allocation3], %s230_s19, %s230_s19, %s231_s20  }
  0x13   :  { %s232_s23 = smov [#allocation5]   ;;  %s179_s27 = scalar_lea.hbm %s316_s1, 256 }
  0x14   :  { %s27_s24 = sshll.u32 %s232_s23, 4  ;;  %p180_p8 = scmp.ne.s32.totalorder %s316_s1, %s179_s27  ;;  %s28_s24 = int_to_ptr.vmem [resolvable:$true] %s27_s24 }
  0x15   :  { %p183_p9 = scmp.lt.u32.totalorder %s179_s27, %s316_s1 }
  0x17   :  { %p185_p10 = pnand %p183_p9, %p180_p8 }
  0x19   :  { %188 = shalt.err (!%p185_p10)
}
  0x1a   :  { %s189_s4 = scalar_lea.vmem %s28_s24, 256  ;;  %p194_p12 = scmp.lt.s32.totalorder %s28_s24, %s28_s24 }
  0x1b   :  { %p190_p11 = scmp.ne.s32.totalorder %s28_s24, %s189_s4  ;;  %p195_p13 = scmp.lt.s32.totalorder %s189_s4, %s189_s4 }
  0x1d   :  { %p196_p0 = por %p195_p13, %p194_p12 }
  0x1f   :  { %p197_p1 = pnand %p196_p0, %p190_p11 }
  0x21   :  { %200 = shalt.err (!%p197_p1)
}
  0x22   :  { %33 = dma.hbm_to_vmem [thread:$0]  %s316_s1, 256, %s28_s24, [#allocation6], %s230_s19, %s230_s19, %s231_s20  }
  0x23   :  { %223 = dma.done.wait [#allocation3], 256  }
  0x24   :  { %224 = vsyncadd [#allocation3], 4294967040 }
  0x25   :  { %225 = dma.done.wait [#allocation6], 256  }
  0x26   :  { %226 = vsyncadd [#allocation6], 4294967040  ;;  %v273_v0 = vld [vmem:[#allocation2] sm:$0xff]  ;;  %v275_v1 = vld [vmem:[#allocation2 + $0x8] sm:$0xff]  ;;  %s233_s1 = smov [#allocation7]  }
  0x27   :  { %v44_v2 = vand.u32 2147483647, %v273_v0  ;;  %v45_v3 = vand.u32 2147483647, %v275_v1  ;;  %v42_v21 = vld [vmem:[#allocation5] sm:$0xff]  ;;  %v43_v24 = vld [vmem:[#allocation5 + $0x8] sm:$0xff] }
  0x28   :  { %v52_v25 = vmax.f32 %v273_v0, 0.0  ;;  %v53_v27 = vmax.f32 %v275_v1, 0.0  ;;  %v54_v28 = vmul.f32 %v42_v21, %v273_v0  ;;  %v55_v29 = vmul.f32 %v43_v24, %v275_v1  ;;  %s130_s6 = sshll.u32 %s233_s1, 4  ;;  %s131_s6 = int_to_ptr.vmem [resolvable:$true] %s130_s6 }
  0x29   :  { %v46_v4 = vsub.f32 0.0, %v44_v2  ;;  %v47_v5 = vsub.f32 0.0, %v45_v3  ;;  %vm94_vm0 = vcmp.ge.f32.partialorder %v273_v0, 0.0  ;;  %v112_v33 = vsub.f32 1.0, %v42_v21  ;;  %s201_s7 = scalar_lea.vmem %s131_s6, 128  ;;  %p206_p3 = scmp.lt.s32.totalorder %s131_s6, %s131_s6 }
  0x2a   :  { %vm95_vm1 = vcmp.ge.f32.partialorder %v275_v1, 0.0  ;;  %vm100_vm2 = vcmp.ge.f32.partialorder %v42_v21, 0.5  ;;  %v113_v41 = vsub.f32 1.0, %v43_v24  ;;  %vm101_vm3 = vcmp.ge.f32.partialorder %v43_v24, 0.5  ;;  %p202_p2 = scmp.ne.s32.totalorder %s131_s6, %s201_s7  ;;  %p207_p4 = scmp.lt.s32.totalorder %s201_s7, %s201_s7 }
  0x2b   :  { %v48_v6 = vmul.f32 1.442695, %v46_v4  ;;  %v50_v7 = vmul.f32 1.442695, %v47_v5  ;;  %v110_v43 = vmul.f32 0.5, %v42_v21  ;;  %v111_v44 = vmul.f32 0.5, %v43_v24 }
  0x2c   :  { %v114_v48 = vmul.f32 0.5, %v112_v33  ;;  %v115_v56 = vmul.f32 0.5, %v113_v41  ;;  %v56_v57 = vsub.f32 %v52_v25, %v54_v28  ;;  %v57_v59 = vsub.f32 %v53_v27, %v55_v29  ;;  %p208_p5 = por %p207_p4, %p206_p3 }
  0x2d   :  { %145 = vpow2.f32 %v48_v6 }
  0x2e   :  { %147 = vpow2.f32 %v50_v7  ;;  %v116_v2 = vadd.f32 %v114_v48, %v110_v43  ;;  %v117_v1 = vadd.f32 %v115_v56, %v111_v44  ;;  %p209_p6 = pnand %p208_p5, %p202_p2 }
  0x37   :  { %v146_v8 = vpop.eup %145 }
  0x38   :  { %v148_v9 = vpop.eup %147  ;;  %v58_v10 = vadd.f32 1.0, %v146_v8  ;;  %v61_v19 = vmul.f32 -0.5, %v146_v8  ;;  %v64_v35 = vand.u32 2147483647, %v146_v8 }
  0x39   :  { %v67_v11 = vadd.f32 1.0, %v148_v9  ;;  %v70_v22 = vmul.f32 -0.5, %v148_v9  ;;  %v73_v39 = vand.u32 2147483647, %v148_v9 }
  0x3a   :  { %149 = vrcp.f32 %v58_v10  ;;  %v62_v31 = vadd.f32 1.0, %v61_v19  ;;  %vm285_vm4 = vcmp.lt.f32.partialorder %v64_v35, 0.0004427343 }
  0x3b   :  { %151 = vrcp.f32 %v67_v11  ;;  %v71_v36 = vadd.f32 1.0, %v70_v22  ;;  %vm291_vm5 = vcmp.lt.f32.partialorder %v73_v39, 0.0004427343 }
  0x3c   :  { %153 = vlog2.f32 %v58_v10  ;;  %v63_v46 = vmul.f32 %v146_v8, %v62_v31 }
  0x3d   :  { %155 = vlog2.f32 %v67_v11  ;;  %v72_v51 = vmul.f32 %v148_v9, %v71_v36 }
  0x44   :  { %v150_v12 = vpop.eup %149 }
  0x45   :  { %v152_v13 = vpop.eup %151  ;;  %v82_v14 = vmul.f32 %v150_v12, %v58_v10 }
  0x46   :  { %v83_v15 = vmul.f32 %v152_v13, %v67_v11  ;;  %v154_v34 = vpop.eup %153 }
  0x47   :  { %v84_v16 = vsub.f32 2.0, %v82_v14  ;;  %v156_v38 = vpop.eup %155  ;;  %v60_v45 = vmul.f32 0.6931472, %v154_v34 }
  0x48   :  { %v85_v17 = vsub.f32 2.0, %v83_v15  ;;  %v69_v50 = vmul.f32 0.6931472, %v156_v38 }
  0x49   :  { %v86_v18 = vmul.f32 %v150_v12, %v84_v16  ;;  %v66_v60 = vsel %vm285_vm4, %v63_v46, %v60_v45 }
  0x4a   :  { %v87_v20 = vmul.f32 %v152_v13, %v85_v17  ;;  %v75_v62 = vsel %vm291_vm5, %v72_v51, %v69_v50  ;;  %v76_v4 = vadd.f32 %v66_v60, %v56_v57 }
  0x4b   :  { %v88_v23 = vmul.f32 %v86_v18, %v58_v10  ;;  %v77_v6 = vadd.f32 %v75_v62, %v57_v59 }
  0x4c   :  { %v89_v26 = vmul.f32 %v87_v20, %v67_v11 }
  0x4d   :  { %v90_v30 = vsub.f32 2.0, %v88_v23 }
  0x4e   :  { %v91_v32 = vsub.f32 2.0, %v89_v26 }
  0x4f   :  { %v92_v37 = vmul.f32 %v90_v30, %v86_v18 }
  0x50   :  { %v93_v40 = vmul.f32 %v91_v32, %v87_v20 }
  0x51   :  { %v96_v42 = vmul.f32 %v146_v8, %v92_v37 }
  0x52   :  { %v97_v47 = vmul.f32 %v148_v9, %v93_v40 }
  0x53   :  { %v98_v52 = vsel %vm94_vm0, %v92_v37, %v96_v42 }
  0x54   :  { %v99_v54 = vsel %vm95_vm1, %v93_v40, %v97_v47  ;;  %v102_v55 = vsub.f32 1.0, %v98_v52 }
  0x55   :  { %v103_v58 = vsub.f32 1.0, %v99_v54 }
  0x56   :  { %v104_v61 = vsel %vm100_vm2, %v98_v52, %v102_v55 }
  0x57   :  { %v105_v63 = vsel %vm101_vm3, %v99_v54, %v103_v58  ;;  %v106_v0 = vsub.f32 1.0, %v104_v61 }
  0x58   :  { %v107_v3 = vsub.f32 1.0, %v105_v63 }
  0x59   :  { %v108_v5 = vmul.f32 %v106_v0, %v106_v0 }
  0x5a   :  { %v109_v7 = vmul.f32 %v107_v3, %v107_v3 }
  0x5b   :  { %v118_v8 = vmul.f32 %v116_v2, %v108_v5 }
  0x5c   :  { %v119_v9 = vmul.f32 %v117_v1, %v109_v7 }
  0x5d   :  { %v120_v10 = vmul.f32 %v118_v8, %v76_v4 }
  0x5e   :  { %v121_v11 = vmul.f32 %v119_v9, %v77_v6 }
  0x60   :  { %v122_v12 = vadd.f32 %v121_v11, %v120_v10 }
  0x62   :  { %123 = vst [vmem:[#allocation7] sm:$0xff] %v122_v12 }
  0x63   :  { %212 = shalt.err (!%p209_p6)
}
  0x64   :  { %s213_s10 = scalar_lea.hbm %s317_s2, 128 }
  0x65   :  { %p214_p7 = scmp.ne.s32.totalorder %s317_s2, %s213_s10  ;;  %p217_p8 = scmp.lt.u32.totalorder %s213_s10, %s317_s2 }
  0x67   :  { %p219_p9 = pnand %p217_p8, %p214_p7 }
  0x69   :  { %222 = shalt.err (!%p219_p9)
}
  0x6a   :  { %133 = dma.vmem_to_hbm [thread:$0]  %s131_s6, 128, %s317_s2, [#allocation4]  }
  0x6b   :  { %227 = dma.done.wait [#allocation4], 128  }
  0x6c   :  { %228 = vsyncadd [#allocation4], 4294967168 }
  0x6d   :  { %137 = vsyncpa [#allocation3], 1 }
  0x6e   :  { %138 = vsyncpa [#allocation6], 1 }
  0x6f   :  { %139 = vsyncpa [#allocation4], 1 }

</bundles_post_ra>
